<compile_context>
chip_gen: v6e
topology: v6e:2x2x1
jax: 0.10.0
libtpu: 0.0.40
codegen_flags: <defaults>
</compile_context>

<pallas_src>
import functools
import math

import jax
import jax.numpy as jnp
from jax.experimental import pallas as pl
from jax.experimental.pallas import tpu as pltpu


# ---------------------------------------------------------------------------
# Kernels
# ---------------------------------------------------------------------------

def _cembed_single_kernel(x_ref, w_ref, b_ref, o_ref):
    # Whole K in one block: out = x @ W + b.  No accumulator / epilogue.
    # x_ref: (M, K) bf16 resident | w_ref: (K, tn) bf16 | b_ref: (1, tn) f32
    # o_ref: (M, tn) f32
    o_ref[...] = (
        jnp.dot(x_ref[...], w_ref[...], preferred_element_type=jnp.float32)
        + b_ref[...]
    ).astype(o_ref.dtype)


def _cembed_reduce_kernel(x_ref, w_ref, b_ref, o_ref):
    # grid = (d_model//tn, K//tk); reduction axis (k) is last.
    # x is resident (constant block index) and sliced in-kernel -> no per-step
    # DMA for it.  The output block index is constant across k, so o_ref is
    # the f32 accumulator: init with the pre-summed bias at k == 0, then
    # accumulate native-bf16 MXU partials (f32 accumulation) directly.
    k = pl.program_id(1)
    tk = w_ref.shape[0]

    @pl.when(k == 0)
    def _():
        o_ref[...] = jnp.broadcast_to(b_ref[...], o_ref.shape).astype(o_ref.dtype)

    start = pl.multiple_of(k * tk, 128)
    o_ref[...] += jnp.dot(
        x_ref[:, pl.ds(start, tk)], w_ref[...],
        preferred_element_type=jnp.float32,
    ).astype(o_ref.dtype)


# ---------------------------------------------------------------------------
# Tile selection
# ---------------------------------------------------------------------------

def _pick_tn(d_model):
    """Lane-dense d_model tile.  Prefer >= 2 blocks when d_model >= 256 so the
    'parallel' axis shards the weight stream across both v7x TensorCores.
    Non-multiple-of-128 d_model falls back to the full extent (legal, masked
    stores) -- pad offline if that ever matters."""
    if d_model % 128 != 0:
        return d_model
    cands = [c for c in (1024, 768, 512, 384, 256, 128) if d_model % c == 0]
    if d_model >= 256:
        halved = [c for c in cands if c <= d_model // 2]
        if halved:
            return halved[0]
    return cands[0] if cands else d_model


def _pick_tk(K, tn, max_weight_tile_bytes):
    """Largest multiple-of-128 K tile whose bf16 weight block stays under
    max_weight_tile_bytes (double-buffered it must fit scoped VMEM on every
    chip).  Non-multiple-of-128 K falls back to a single full-K block."""
    if K % 128 != 0:
        return K
    max_tk = max(128, (max_weight_tile_bytes // (tn * 2)) // 128 * 128)
    for cand in (8192, 4096, 2048, 1024, 512, 256, 128):
        if cand <= max_tk and cand <= K and K % cand == 0:
            return cand
    return K


# ---------------------------------------------------------------------------
# Offline parameter folding (one-time, never per forward)
# ---------------------------------------------------------------------------

def fold_params(weights, biases, weight_dtype=jnp.bfloat16):
    """weights: (F, d_model, B) stacked per-feature nn.Linear weights.  The
    PyTorch forward is only well-defined when every d_feature_i == B (each
    Linear consumes a length-B column), which the stacked shape enforces.
    biases: (F, d_model).
    Returns:
      w_folded: (B*F, d_model) in `weight_dtype`, row b*F + f == weights[f,:,b]
                so a plain row-major flatten of x lines up with it.
      b_sum:    (1, d_model) f32, loop-invariant sum of all biases."""
    F, d_model, B = weights.shape
    assert biases.shape == (F, d_model)
    w_folded = jnp.transpose(weights, (2, 0, 1)).reshape(B * F, d_model)
    b_sum = jnp.sum(biases.astype(jnp.float32), axis=0, keepdims=True)
    return w_folded.astype(weight_dtype), b_sum


# ---------------------------------------------------------------------------
# Forward
# ---------------------------------------------------------------------------

def continuous_embedding(x, w_folded, b_sum, *, max_weight_tile_bytes=4 << 20):
    """x: (B, F) single sample (returns (d_model,), PyTorch semantics) or
    (M, B, F) batched samples (returns (M, d_model), amortizes the weight
    stream: GEMV -> GEMM).  w_folded: (B*F, d_model) bf16; b_sum: (1,d_model)."""
    squeeze = x.ndim == 2
    if squeeze:
        x = x[None]
    M, B, F = x.shape
    K, d_model = w_folded.shape
    assert K == B * F, "folded weights must match B*F"

    # Row-major flatten (free) + bf16 cast: MXU consumes bf16 natively, no
    # in-kernel upcast of the streamed weight tile.
    x_flat = x.reshape(M, K).astype(jnp.bfloat16)

    tn = _pick_tn(d_model)
    tk = _pick_tk(K, tn, max_weight_tile_bytes)

    cost = pl.CostEstimate(
        flops=2 * M * K * d_model,
        transcendentals=0,
        bytes_accessed=(x_flat.size * 2
                        + w_folded.size * w_folded.dtype.itemsize
                        + b_sum.size * 4
                        + M * d_model * 4),
    )
    out_shape = jax.ShapeDtypeStruct((M, d_model), jnp.float32)

    if tk == K:
        # Single-K-block fast path: no reduction axis, no accumulator.
        grid_spec = pltpu.PrefetchScalarGridSpec(
            num_scalar_prefetch=0,
            grid=(d_model // tn,),
            in_specs=[
                pl.BlockSpec((M, K), lambda n: (0, 0)),       # x (resident)
                pl.BlockSpec((K, tn), lambda n: (0, n)),      # bf16 weights
                pl.BlockSpec((1, tn), lambda n: (0, n)),      # pre-summed bias
            ],
            out_specs=pl.BlockSpec((M, tn), lambda n: (0, n)),
        )
        kernel = _cembed_single_kernel
        dims = ("parallel",)
    else:
        grid_spec = pltpu.PrefetchScalarGridSpec(
            num_scalar_prefetch=0,
            grid=(d_model // tn, K // tk),
            in_specs=[
                pl.BlockSpec((M, K), lambda n, k: (0, 0)),    # x resident; sliced in-kernel
                pl.BlockSpec((tk, tn), lambda n, k: (k, n)),  # streamed bf16 weights
                pl.BlockSpec((1, tn), lambda n, k: (0, n)),   # pre-summed bias
            ],
            out_specs=pl.BlockSpec((M, tn), lambda n, k: (0, n)),
        )
        kernel = _cembed_reduce_kernel
        dims = ("parallel", "arbitrary")

    out = pl.pallas_call(
        kernel,
        out_shape=out_shape,
        grid_spec=grid_spec,
        compiler_params=pltpu.CompilerParams(
            dimension_semantics=dims,
            vmem_limit_bytes=32 * 1024 * 1024,   # covers v5e's 16 MiB default scope
        ),
        cost_estimate=cost,
    )(x_flat, w_folded, b_sum)
    return out[0] if squeeze else out


# ---------------------------------------------------------------------------
# Init + reference (PyTorch-equivalent semantics)
# ---------------------------------------------------------------------------

def init_params(key, d_model, d_features):
    """Deterministic init matching nn.Linear + xavier_uniform_ on the weights."""
    ws, bs = [], []
    for i, d_feature in enumerate(d_features):
        kw, kb = jax.random.split(jax.random.fold_in(key, i))
        a = math.sqrt(6.0 / (d_feature + d_model))           # xavier_uniform_
        w = jax.random.uniform(kw, (d_model, d_feature), jnp.float32, -a, a)
        bound = 1.0 / math.sqrt(d_feature)                    # nn.Linear bias init
        b = jax.random.uniform(kb, (d_model,), jnp.float32, -bound, bound)
        ws.append(w)
        bs.append(b)
    return jnp.stack(ws, 0), jnp.stack(bs, 0)  # (F, d_model, B), (F, d_model)


def reference(x, weights, biases):
    # pure-JAX f32 reference of the PyTorch forward
    F = x.shape[1]
    embs = [weights[i] @ x[:, i] + biases[i] for i in range(F)]
    return jnp.sum(jnp.stack(embs, 0), axis=0)


if __name__ == "__main__":
    key = jax.random.PRNGKey(0)

    # --- Test 1: module-shaped demo (single sample -> single-block fast path) -
    B, F, d_model = 8, 4, 128
    d_features = [B] * F
    kx, kp = jax.random.split(key)
    x = jax.random.normal(kx, (B, F), jnp.float32)
    weights, biases = init_params(kp, d_model, d_features)
    w_folded, b_sum = fold_params(weights, biases)   # one-time offline fold

    fwd = jax.jit(continuous_embedding)
    out = jax.block_until_ready(fwd(x, w_folded, b_sum))
    assert out.shape == (d_model,)

    # apples-to-apples reference (same bf16 casts, f32 accumulate)
    x_bf = x.reshape(1, -1).astype(jnp.bfloat16).astype(jnp.float32)
    ref_folded = (x_bf @ w_folded.astype(jnp.float32) + b_sum).reshape(-1)
    ref_f32 = reference(x, weights, biases)
    assert jnp.allclose(out, ref_folded, atol=2e-3, rtol=2e-3)
    assert jnp.allclose(out, ref_f32, atol=5e-2, rtol=5e-2)

    # --- Test 2: batched samples (GEMV -> GEMM, amortizes the weight stream) -
    M = 3
    xb = jax.random.normal(jax.random.fold_in(key, 1), (M, B, F), jnp.float32)
    out_b = jax.block_until_ready(fwd(xb, w_folded, b_sum))
    ref_b = jnp.stack([reference(xb[m], weights, biases) for m in range(M)], 0)
    assert out_b.shape == (M, d_model)
    assert jnp.allclose(out_b, ref_b, atol=5e-2, rtol=5e-2)

    # --- Test 3: shapes that exercise the K-reduction (weight-streaming) path -
    B2, F2, d2 = 256, 4, 256
    x2 = jax.random.normal(jax.random.fold_in(key, 2), (B2, F2), jnp.float32)
    w2, b2 = init_params(jax.random.fold_in(key, 3), d2, [B2] * F2)
    wf2, bs2 = fold_params(w2, b2)
    fwd2 = jax.jit(functools.partial(continuous_embedding,
                                     max_weight_tile_bytes=64 * 1024))
    out2 = jax.block_until_ready(fwd2(x2, wf2, bs2))
    ref2 = reference(x2, w2, b2)
    assert out2.shape == (d2,)
    assert jnp.allclose(out2, ref2, atol=5e-2, rtol=5e-2)

    print("KERNEL_OK")
</pallas_src>

<mosaic_0001>
module attributes {stable_mosaic.version = 11 : i64} {
  func.func @_cembed_single_kernel(%arg0: i32, %arg1: memref<1x32xbf16, #tpu.memory_space<vmem>>, %arg2: memref<32x128xbf16, #tpu.memory_space<vmem>>, %arg3: memref<1x128xf32, #tpu.memory_space<vmem>>, %arg4: memref<1x128xf32, #tpu.memory_space<vmem>>) attributes {dimension_semantics = [#tpu.dimension_semantics<parallel>], iteration_bounds = array<i64: 1>, scalar_prefetch = 0 : i64, scratch_operands = 0 : i64, tpu.core_type = #tpu.core_type<tc>, window_params = [{pipeline_mode = #tpu.pipeline_mode<synchronous>, transform_indices = @transform_0, window_bounds = array<i64: 1, 32>}, {transform_indices = @transform_1, window_bounds = array<i64: 32, 128>}, {transform_indices = @transform_2, window_bounds = array<i64: 1, 128>}, {transform_indices = @transform_3, window_bounds = array<i64: 1, 128>}]} {
    %c0 = arith.constant 0 : index
    %c0_0 = arith.constant 0 : index
    %0 = vector.load %arg1[%c0, %c0_0] : memref<1x32xbf16, #tpu.memory_space<vmem>>, vector<1x32xbf16>
    %c0_1 = arith.constant 0 : index
    %c0_2 = arith.constant 0 : index
    %1 = vector.load %arg2[%c0_1, %c0_2] : memref<32x128xbf16, #tpu.memory_space<vmem>>, vector<32x128xbf16>
    %cst = arith.constant dense<0.000000e+00> : vector<1x128xf32>
    %2 = tpu.matmul %0, %1, %cst {dimension_numbers = #tpu.dot_dimension_numbers<[1], [0], [0], [1], [0, 0, 1, 1], [], []>} : vector<1x32xbf16>, vector<32x128xbf16>, vector<1x128xf32> -> vector<1x128xf32>
    %c0_3 = arith.constant 0 : index
    %c0_4 = arith.constant 0 : index
    %3 = vector.load %arg3[%c0_3, %c0_4] : memref<1x128xf32, #tpu.memory_space<vmem>>, vector<1x128xf32>
    %4 = arith.addf %2, %3 : vector<1x128xf32>
    %c0_5 = arith.constant 0 : index
    %c0_6 = arith.constant 0 : index
    %5 = vector.load %arg4[%c0_5, %c0_6] : memref<1x128xf32, #tpu.memory_space<vmem>>, vector<1x128xf32>
    tpu.vector_store %arg4[%c0_5, %c0_6], %4 {strides = array<i32>} : memref<1x128xf32, #tpu.memory_space<vmem>>, vector<1x128xf32>,
    return
  }
  func.func @transform_0(%arg0: i32) -> (i32, i32) {
    %c0_i32 = arith.constant 0 : i32
    %c0_i32_0 = arith.constant 0 : i32
    %c0_i32_1 = arith.constant 0 : i32
    return %c0_i32, %c0_i32_0 : i32, i32
  }
  func.func @transform_1(%arg0: i32) -> (i32, i32) {
    %c0_i32 = arith.constant 0 : i32
    %c0_i32_0 = arith.constant 0 : i32
    return %c0_i32, %arg0 : i32, i32
  }
  func.func @transform_2(%arg0: i32) -> (i32, i32) {
    %c0_i32 = arith.constant 0 : i32
    %c0_i32_0 = arith.constant 0 : i32
    return %c0_i32, %arg0 : i32, i32
  }
  func.func @transform_3(%arg0: i32) -> (i32, i32) {
    %c0_i32 = arith.constant 0 : i32
    %c0_i32_0 = arith.constant 0 : i32
    return %c0_i32, %arg0 : i32, i32
  }
}

</mosaic_0001>

<bundles_post_ra>
// kernel: continuous_embedding.1
= control target key start
LH: loop header
LB: loop body
LE: loop exit
PB: predicated region body
PF: predicated region fallthrough
CT: control target
= control target key end

     0   :  { %v134_v1 = vmov 0.0   ;;  %vm135_vm0 = vmmov 0   ;;  %s172_s0 = inlined_call_operand.vmem [shape: bf16[1,32], index: 0, kind: input, shape index: {}]   ;;  %s173_s1 = inlined_call_operand.vmem [shape: bf16[32,128], index: 1, kind: input, shape index: {}]   ;;  %s174_s2 = inlined_call_operand.vmem [shape: f32[1,128], index: 2, kind: input, shape index: {}]   ;;  %s175_s3 = inlined_call_operand.hbm [shape: f32[1,128], index: 3, kind: output, shape index: {}]  }
   0x1   :  { %v110_v0 = vld [vmem:[%s173_s1 + $0x8] sm:$0xff]   ;;  %99 = vmatprep.subr.bf16.mxu0 %v134_v1  ;;  %v111_v2 = vld [vmem:[%s173_s1] sm:$0xff]   ;;  %103 = vmatprep.mubr.msk.bf16.mxu0 %vm135_vm0, %v134_v1 }
   0x2   :  { %100 = vmatpush3.bf16.msra.mxu0 %v110_v0 }
   0x3   :  { %101 = vmatprep.subr.bf16.mxu0 %v134_v1 }
   0x4   :  { %8 = vsyncpa [#allocation3], 0  ;;  %v16_v3 = vld [vmem:[%s172_s0] sm:$0x1]  ;;  %vm34_vm1 = vcmask 261120   ;;  %s136_s20 = smov [#allocation2]  }
   0x5   :  { %v21_v4 = vld [vmem:[%s174_s2] sm:$0x1]  ;;  %s85_s21 = sshll.u32 %s136_s20, 4  ;;  %s86_s21 = int_to_ptr.vmem [resolvable:$true] %s85_s21 }
   0x6   :  { %102 = vmatpush3.bf16.msra.mxu0 %v111_v2  ;;  %s112_s1 = scalar_lea.vmem %s86_s21, 16  ;;  %s116_s22 = scalar_lea.vmem %s86_s21, 32 }
   0x7   :  { %p113_p0 = scmp.ne.s32.totalorder %s86_s21, %s112_s1  ;;  %p117_p1 = scmp.lt.s32.totalorder %s86_s21, %s86_s21 }
   0x8   :  { %p118_p2 = scmp.lt.s32.totalorder %s116_s22, %s112_s1 }
   0x9   :  { %104 = vmatmul.mubr.msk.bf16.vlgmr.msra.gmra.mxu0 %vm34_vm1, %v16_v3 }
   0xa   :  { %p119_p3 = por %p118_p2, %p117_p1 }
   0xc   :  { %p120_p4 = pnand %p119_p3, %p113_p0 }
  0xc9   :  { %v72_v5 = vpop.f32.mrf.mxu0 }
  0xca   :  { %v73_v6 = vadd.f32 %v72_v5, %v21_v4 }
  0xcb   :  { %v105_v7 = vpop.f32.mrf.mxu0 }
  0xcc   :  { %78 = vst [vmem:[#allocation2] sm:$0x1] %v73_v6 }
  0xcd   :  { %v75_v8 = vpop.f32.mrf.mxu0 }
  0xce   :  { %123 = shalt.err (!%p120_p4)
}
  0xcf   :  { %88 = dma.vmem_to_hbm [thread:$0]  %s86_s21, 16, %s175_s3, [#allocation3]   ;;  %v106_v9 = vpop.f32.mrf.mxu0 }
  0xd0   :  { %132 = dma.done.wait [#allocation3], 16  }
  0xd1   :  { %133 = vsyncadd [#allocation3], 4294967280 }
  0xd2   :  { %92 = vsyncpa [#allocation3], 1 }

</bundles_post_ra>
